<compile_context>
chip_gen: v6e
topology: v6e:2x2x1
jax: 0.10.0
libtpu: 0.0.40
codegen_flags: <defaults>
</compile_context>

<pallas_src>
import functools

import jax
import jax.numpy as jnp
from jax.experimental import pallas as pl
from jax.experimental.pallas import tpu as pltpu

_EPS = 1e-5  # torch.nn.GroupNorm default eps
_MIN_GRID_STEPS = 4  # 2 TensorCores (v7x) x 2 so megacore sharding has work


@functools.lru_cache(maxsize=None)
def _device_kind() -> str:
    try:
        return jax.devices()[0].device_kind.lower()
    except Exception:
        return ""


@functools.lru_cache(maxsize=None)
def _vmem_capacity_bytes() -> int:
    """Per-core VMEM capacity, used to size blocks / vmem limit per generation."""
    try:
        return int(pltpu.get_tpu_info().vmem_capacity_bytes)
    except Exception:
        pass
    # Fallback: v7x has 64 MiB per TensorCore, v4/v5e/v6e have 128 MiB.
    return (64 << 20) if "v7" in _device_kind() else (128 << 20)


def _compute_dtype(x_dtype):
    """bf16 gate math on chips with a bf16 VPU (v6e/v7x); f32 otherwise."""
    if jnp.dtype(x_dtype) == jnp.dtype(jnp.bfloat16):
        kind = _device_kind()
        if ("v5 lite" in kind) or ("v5e" in kind) or ("v5lite" in kind):
            return jnp.float32  # v5e VPU/EUP have no bf16 support
        return jnp.bfloat16
    return jnp.float32


def _choose_blocks(b, c2, hw, elem_bytes, budget_bytes, min_steps):
    """Pick (batch, channel) block sizes.

    The input block is (nb, 2, cbk, hw); we target ~budget_bytes per block (the
    kernel is HBM-bound, so big blocks amortize the ~0.35us per-step overhead),
    keep cbk a multiple of 8 (full vreg sublanes) when c2 allows it, and then
    shrink blocks if needed so the grid keeps >= min_steps steps for megacore.
    """
    def divisors(n):
        return [d for d in range(1, n + 1) if n % d == 0]

    # Channel-block candidates: multiples of 8 (no sublane padding) plus c2 itself
    # (full dim is always legal).  Awkward c2 (< 8 / not 8-divisible) falls back to
    # the full dim rather than a padded tail.
    cb_cands = sorted({d for d in divisors(c2) if d % 8 == 0} | {c2})
    nb_cands = sorted(divisors(b))

    def block_bytes(nb, cb):
        return nb * 2 * cb * hw * elem_bytes

    # Largest channel block (with nb=1) under budget; if even the smallest legal
    # candidate exceeds the budget (huge hw) accept it anyway.
    cb = cb_cands[0]
    for d in cb_cands:
        if block_bytes(1, d) <= budget_bytes:
            cb = d
    nb = 1
    for d in nb_cands:
        if block_bytes(d, cb) <= budget_bytes:
            nb = d

    def steps(nb_, cb_):
        return (b // nb_) * (c2 // cb_)

    # Keep at least min_steps grid steps so both v7x TensorCores get work
    # (costs ~nothing on v5e/v6e).  Shrink batch first, then channels.
    while steps(nb, cb) < min_steps:
        if nb > 1:
            nb = max(d for d in nb_cands if d < nb)
        elif cb > cb_cands[0]:
            cb = max(d for d in cb_cands if d < cb)
        else:
            break
    return nb, cb


def _sa_kernel(x_ref, p_ref, o_ref, *, compute_dtype):
    # x_ref: (nb, 2, cbk, hw)  input block (axis 1 = source channel half)
    # p_ref: (2, cbk, 3)       fused per-channel coefficients [A, M, B]
    # o_ref: (nb, cbk, 2*hw)   output block, already in channel-shuffled layout
    x = x_ref[...]
    xf = x.astype(jnp.float32)
    p = p_ref[...]

    inv_hw = jnp.float32(1.0 / x.shape[-1])

    # ---- one-pass statistics (f32 accumulation) ----------------------------
    s1 = jnp.sum(xf, axis=-1, keepdims=True)              # (nb, 2, cbk, 1)
    s2 = jnp.sum(xf * xf, axis=-1, keepdims=True)
    mean = s1 * inv_hw
    var = jnp.maximum(s2 * inv_hw - mean * mean, 0.0)      # guard cancellation

    pa = p[:, :, 0:1][None]                                # (1, 2, cbk, 1)
    pb = p[:, :, 1:2][None]
    pc = p[:, :, 2:3][None]

    a = pa * jax.lax.rsqrt(var + _EPS)                     # (nb, 2, cbk, 1)
    bias = pb * mean + pc                                  # (nb, 2, cbk, 1)

    # ---- gating (bf16 on v6e/v7x for bf16 inputs, f32 otherwise) -----------
    cd = compute_dtype
    xc = x.astype(cd) - mean.astype(cd)
    gate = jax.nn.sigmoid(a.astype(cd) * xc + bias.astype(cd))
    y = x.astype(cd) * gate                                # (nb, 2, cbk, hw)

    # Lane-axis concat of the two halves folds channel_shuffle(groups=2) into the
    # store: the output block is the final shuffled layout, one full store.
    o_ref[...] = jnp.concatenate([y[:, 0], y[:, 1]], axis=-1).astype(o_ref.dtype)


@functools.partial(jax.jit, static_argnames=("groups",))
def cross_branch_forward(x, params, groups):
    b, c, h, w = x.shape
    assert c % (2 * groups) == 0, "channels must be divisible by 2*groups"
    cg = c // (2 * groups)
    c2 = c // 2
    hw = h * w

    # Free view: source channel p = k*c2 + j  <->  x2[b, k, j].
    x2 = x.reshape(b, 2, c2, hw)

    # Fused per-channel coefficient table, indexed by source channel p.
    ch = jnp.arange(c) % (2 * cg)
    is_sp = ch >= cg                        # spatial-attention branch?
    idx = jnp.where(is_sp, ch - cg, ch)     # index into the (cg,) param vectors
    f32 = jnp.float32
    cw = params["cweight"][idx].astype(f32)
    cb_ = params["cbias"][idx].astype(f32)
    sw = params["sweight"][idx].astype(f32)
    sb = params["sbias"][idx].astype(f32)
    gw = params["gn_weight"][idx].astype(f32)
    gb = params["gn_bias"][idx].astype(f32)

    pa = jnp.where(is_sp, sw * gw, 0.0)         # multiplies rsqrt(var+eps)*(x-mean)
    pb = jnp.where(is_sp, 0.0, cw)              # multiplies the channel mean
    pc = jnp.where(is_sp, sw * gb + sb, cb_)    # additive bias
    pars = jnp.stack([pa, pb, pc], axis=-1).reshape(2, c2, 3)

    # Generation-aware blocking: ~4 MiB blocks on 128-MiB-VMEM chips, ~2.7 MiB on
    # v7x (64 MiB VMEM); /24 leaves room for 2x(in)+2x(out) double buffers, lane
    # padding and f32 temporaries.
    elem_bytes = x.dtype.itemsize
    vmem_cap = _vmem_capacity_bytes()
    budget = max(1 << 20, min(4 << 20, vmem_cap // 24))
    vmem_limit = int(min(vmem_cap * 3 // 4, 96 << 20))
    nb, cbk = _choose_blocks(b, c2, hw, elem_bytes, budget, _MIN_GRID_STEPS)

    n_cb = c2 // cbk
    n_b = b // nb

    kernel = functools.partial(_sa_kernel, compute_dtype=_compute_dtype(x.dtype))

    out = pl.pallas_call(
        kernel,
        out_shape=jax.ShapeDtypeStruct((b, c2, 2 * hw), x.dtype),
        grid_spec=pltpu.PrefetchScalarGridSpec(
            num_scalar_prefetch=0,
            # Channel-block axis OUTER, batch INNER: the coefficient table's block
            # index only changes with the outer axis, so it is re-DMA'd n_cb times
            # total instead of every grid step.
            grid=(n_cb, n_b),
            in_specs=[
                pl.BlockSpec((nb, 2, cbk, hw), lambda jc, ib: (ib, 0, jc, 0)),
                pl.BlockSpec((2, cbk, 3), lambda jc, ib: (0, jc, 0)),
            ],
            out_specs=pl.BlockSpec((nb, cbk, 2 * hw), lambda jc, ib: (ib, jc, 0)),
        ),
        compiler_params=pltpu.CompilerParams(
            dimension_semantics=("parallel", "parallel"),
            vmem_limit_bytes=vmem_limit,
        ),
    )(x2, pars)

    # (b, c2, 2*hw) is exactly the channel-shuffled (b, c, h, w) laid out
    # contiguously, so this reshape is metadata-only (no extra HBM pass).
    return out.reshape(b, c, h, w)


def cross_branch_reference(x, params, groups):
    """Plain-JAX reference mirroring the PyTorch sa_layer forward."""
    b, c, h, w = x.shape
    cg = c // (2 * groups)
    xg = x.reshape(b * groups, 2 * cg, h, w)
    x0, x1 = xg[:, :cg], xg[:, cg:]

    cw = params["cweight"].reshape(1, cg, 1, 1)
    cb = params["cbias"].reshape(1, cg, 1, 1)
    sw = params["sweight"].reshape(1, cg, 1, 1)
    sb = params["sbias"].reshape(1, cg, 1, 1)
    gw = params["gn_weight"].reshape(1, cg, 1, 1)
    gb = params["gn_bias"].reshape(1, cg, 1, 1)

    xn = jnp.mean(x0, axis=(2, 3), keepdims=True)
    xn = x0 * jax.nn.sigmoid(cw * xn + cb)

    mean = jnp.mean(x1, axis=(2, 3), keepdims=True)
    var = jnp.mean(jnp.square(x1 - mean), axis=(2, 3), keepdims=True)
    xs = (x1 - mean) / jnp.sqrt(var + _EPS)
    xs = xs * gw + gb
    xs = x1 * jax.nn.sigmoid(sw * xs + sb)

    out = jnp.concatenate([xn, xs], axis=1).reshape(b, c, h, w)
    out = out.reshape(b, 2, c // 2, h, w).transpose(0, 2, 1, 3, 4).reshape(b, c, h, w)
    return out


if __name__ == "__main__":
    B, C, H, W = 2, 32, 8, 8
    GROUPS = 4
    CG = C // (2 * GROUPS)

    key = jax.random.PRNGKey(0)
    kx, k1, k2, k3, k4, k5, k6 = jax.random.split(key, 7)

    x = jax.random.normal(kx, (B, C, H, W), dtype=jnp.float32)

    # Deterministic parameter init (module default is zeros/ones; use small random
    # values so every term in the forward is exercised).
    params = {
        "cweight":   0.5 * jax.random.normal(k1, (CG,), jnp.float32),
        "cbias":     1.0 + 0.1 * jax.random.normal(k2, (CG,), jnp.float32),
        "sweight":   0.5 * jax.random.normal(k3, (CG,), jnp.float32),
        "sbias":     1.0 + 0.1 * jax.random.normal(k4, (CG,), jnp.float32),
        "gn_weight": 1.0 + 0.1 * jax.random.normal(k5, (CG,), jnp.float32),
        "gn_bias":   0.1 * jax.random.normal(k6, (CG,), jnp.float32),
    }

    out = cross_branch_forward(x, params, GROUPS)
    out = jax.block_until_ready(out)

    ref = cross_branch_reference(x, params, GROUPS)
    assert out.shape == (B, C, H, W)
    assert jnp.allclose(out, ref, atol=1e-5, rtol=1e-5), "mismatch vs reference"

    print("KERNEL_OK")
</pallas_src>

<mosaic_0001>
module attributes {stable_mosaic.version = 11 : i64} {
  func.func @_sa_kernel(%arg0: i32, %arg1: i32, %arg2: memref<1x2x8x64xf32, #tpu.memory_space<vmem>>, %arg3: memref<2x8x3xf32, #tpu.memory_space<vmem>>, %arg4: memref<1x8x128xf32, #tpu.memory_space<vmem>>) attributes {dimension_semantics = [#tpu.dimension_semantics<parallel>, #tpu.dimension_semantics<parallel>], iteration_bounds = array<i64: 2, 2>, scalar_prefetch = 0 : i64, scratch_operands = 0 : i64, tpu.core_type = #tpu.core_type<tc>, window_params = [{transform_indices = @transform_0, window_bounds = array<i64: 1, 2, 8, 64>}, {transform_indices = @transform_1, window_bounds = array<i64: 2, 8, 3>}, {transform_indices = @transform_2, window_bounds = array<i64: 1, 8, 128>}]} {
    %c0 = arith.constant 0 : index
    %c0_0 = arith.constant 0 : index
    %c0_1 = arith.constant 0 : index
    %c0_2 = arith.constant 0 : index
    %0 = vector.load %arg2[%c0, %c0_0, %c0_1, %c0_2] : memref<1x2x8x64xf32, #tpu.memory_space<vmem>>, vector<1x2x8x64xf32>
    %c0_3 = arith.constant 0 : index
    %c0_4 = arith.constant 0 : index
    %c0_5 = arith.constant 0 : index
    %1 = vector.load %arg3[%c0_3, %c0_4, %c0_5] : memref<2x8x3xf32, #tpu.memory_space<vmem>>, vector<2x8x3xf32>
    %cst = arith.constant dense<0.000000e+00> : vector<1x2x8xf32>
    %2 = vector.multi_reduction <add>, %0, %cst [3] : vector<1x2x8x64xf32> to vector<1x2x8xf32>
    %3 = vector.shape_cast %2 : vector<1x2x8xf32> to vector<1x2x8x1xf32>
    %4 = arith.mulf %0, %0 : vector<1x2x8x64xf32>
    %cst_6 = arith.constant dense<0.000000e+00> : vector<1x2x8xf32>
    %5 = vector.multi_reduction <add>, %4, %cst_6 [3] : vector<1x2x8x64xf32> to vector<1x2x8xf32>
    %6 = vector.shape_cast %5 : vector<1x2x8xf32> to vector<1x2x8x1xf32>
    %cst_7 = arith.constant 1.562500e-02 : f32
    %7 = vector.broadcast %cst_7 : f32 to vector<1x2x8x1xf32>
    %8 = arith.mulf %3, %7 : vector<1x2x8x1xf32>
    %cst_8 = arith.constant 1.562500e-02 : f32
    %9 = vector.broadcast %cst_8 : f32 to vector<1x2x8x1xf32>
    %10 = arith.mulf %6, %9 : vector<1x2x8x1xf32>
    %11 = arith.mulf %8, %8 : vector<1x2x8x1xf32>
    %12 = arith.subf %10, %11 : vector<1x2x8x1xf32>
    %cst_9 = arith.constant 0.000000e+00 : f32
    %13 = vector.broadcast %cst_9 : f32 to vector<1x2x8x1xf32>
    %14 = arith.maximumf %12, %13 : vector<1x2x8x1xf32>
    %15 = vector.extract_strided_slice %1 {offsets = [0, 0, 0], sizes = [2, 8, 1], strides = [1, 1, 1]} : vector<2x8x3xf32> to vector<2x8x1xf32>
    %16 = vector.shape_cast %15 : vector<2x8x1xf32> to vector<1x2x8x1xf32>
    %17 = vector.extract_strided_slice %1 {offsets = [0, 0, 1], sizes = [2, 8, 1], strides = [1, 1, 1]} : vector<2x8x3xf32> to vector<2x8x1xf32>
    %18 = vector.shape_cast %17 : vector<2x8x1xf32> to vector<1x2x8x1xf32>
    %19 = vector.extract_strided_slice %1 {offsets = [0, 0, 2], sizes = [2, 8, 1], strides = [1, 1, 1]} : vector<2x8x3xf32> to vector<2x8x1xf32>
    %20 = vector.shape_cast %19 : vector<2x8x1xf32> to vector<1x2x8x1xf32>
    %cst_10 = arith.constant 9.99999974E-6 : f32
    %21 = vector.broadcast %cst_10 : f32 to vector<1x2x8x1xf32>
    %22 = arith.addf %14, %21 : vector<1x2x8x1xf32>
    %23 = math.rsqrt %22 : vector<1x2x8x1xf32>
    %24 = arith.mulf %16, %23 : vector<1x2x8x1xf32>
    %25 = arith.mulf %18, %8 : vector<1x2x8x1xf32>
    %26 = arith.addf %25, %20 : vector<1x2x8x1xf32>
    %27 = vector.broadcast %8 : vector<1x2x8x1xf32> to vector<1x2x8x64xf32>
    %28 = arith.subf %0, %27 : vector<1x2x8x64xf32>
    %29 = vector.broadcast %24 : vector<1x2x8x1xf32> to vector<1x2x8x64xf32>
    %30 = arith.mulf %29, %28 : vector<1x2x8x64xf32>
    %31 = vector.broadcast %26 : vector<1x2x8x1xf32> to vector<1x2x8x64xf32>
    %32 = arith.addf %30, %31 : vector<1x2x8x64xf32>
    %33 = arith.negf %32 : vector<1x2x8x64xf32>
    %34 = math.exp %33 : vector<1x2x8x64xf32>
    %cst_11 = arith.constant 1.000000e+00 : f32
    %35 = vector.broadcast %cst_11 : f32 to vector<1x2x8x64xf32>
    %36 = arith.addf %35, %34 : vector<1x2x8x64xf32>
    %37 = arith.divf %35, %36 : vector<1x2x8x64xf32>
    %38 = arith.mulf %0, %37 : vector<1x2x8x64xf32>
    %39 = vector.extract_strided_slice %38 {offsets = [0, 0, 0, 0], sizes = [1, 1, 8, 64], strides = [1, 1, 1, 1]} : vector<1x2x8x64xf32> to vector<1x1x8x64xf32>
    %40 = vector.shape_cast %39 : vector<1x1x8x64xf32> to vector<1x8x64xf32>
    %41 = vector.extract_strided_slice %38 {offsets = [0, 1, 0, 0], sizes = [1, 1, 8, 64], strides = [1, 1, 1, 1]} : vector<1x2x8x64xf32> to vector<1x1x8x64xf32>
    %42 = vector.shape_cast %41 : vector<1x1x8x64xf32> to vector<1x8x64xf32>
    %43 = tpu.concatenate %40, %42 in 2 : vector<1x8x64xf32>, vector<1x8x64xf32> -> vector<1x8x128xf32>
    %c0_12 = arith.constant 0 : index
    %c0_13 = arith.constant 0 : index
    %c0_14 = arith.constant 0 : index
    %44 = vector.load %arg4[%c0_12, %c0_13, %c0_14] : memref<1x8x128xf32, #tpu.memory_space<vmem>>, vector<1x8x128xf32>
    tpu.vector_store %arg4[%c0_12, %c0_13, %c0_14], %43 {strides = array<i32>} : memref<1x8x128xf32, #tpu.memory_space<vmem>>, vector<1x8x128xf32>,
    return
  }
  func.func @transform_0(%arg0: i32, %arg1: i32) -> (i32, i32, i32, i32) {
    %c0_i32 = arith.constant 0 : i32
    %c0_i32_0 = arith.constant 0 : i32
    %c0_i32_1 = arith.constant 0 : i32
    return %arg1, %c0_i32, %arg0, %c0_i32_0 : i32, i32, i32, i32
  }
  func.func @transform_1(%arg0: i32, %arg1: i32) -> (i32, i32, i32) {
    %c0_i32 = arith.constant 0 : i32
    %c0_i32_0 = arith.constant 0 : i32
    %c0_i32_1 = arith.constant 0 : i32
    return %c0_i32, %arg0, %c0_i32_0 : i32, i32, i32
  }
  func.func @transform_2(%arg0: i32, %arg1: i32) -> (i32, i32, i32) {
    %c0_i32 = arith.constant 0 : i32
    %c0_i32_0 = arith.constant 0 : i32
    return %arg1, %arg0, %c0_i32 : i32, i32, i32
  }
}

</mosaic_0001>

<bundles_post_ra>
// kernel: cross_branch_forward.1
= control target key start
LH: loop header
LB: loop body
LE: loop exit
PB: predicated region body
PF: predicated region fallthrough
CT: control target
= control target key end

     0   :  { %s665_s9 = smov 0   ;;  %s667_s10 = smov 0   ;;  %s808_s0 = inlined_call_operand.vmem [shape: f32[2,2,16,64], index: 0, kind: input, shape index: {}]   ;;  %s809_s1 = inlined_call_operand.vmem [shape: f32[2,16,3], index: 1, kind: input, shape index: {}]   ;;  %s810_s2 = inlined_call_operand.vmem [shape: f32[2,16,128], index: 2, kind: output, shape index: {}]  }
   0x1   :  { %s669_s11 = smov 0   ;;  %s671_s12 = smov 0  }
   0x2   :  { %s673_s13 = smov 0   ;;  %s675_s14 = smov 0  }
   0x3   :  { %s677_s15 = smov 0   ;;  %s679_s16 = smov 0  }
   0x4   :  { %s681_s17 = smov 0  }
   0x5 LB: > { %s21_s18 = sadd.s32 1, %s636_s15  ;;  %s24_s19 = sadd.s32 1, %s640_s16  ;;  %s644_s17 = sphi %s681_s17, %s12_s17   ;;  %s640_s16 = sphi %s679_s16, %s820_s16   ;;  %s636_s15 = sphi %s677_s15, %s819_s15   ;;  %s632_s14 = sphi %s675_s14, %s818_s14   ;;  %s628_s13 = sphi %s673_s13, %s817_s13   ;;  %s624_s12 = sphi %s671_s12, %s816_s12   ;;  %s620_s11 = sphi %s669_s11, %s815_s11   ;;  %s616_s10 = sphi %s667_s10, %s814_s10   ;;  %s612_s9 = sphi %s665_s9, %s813_s9  }
   0x6   : > { %p22_p0 = scmp.ge.s32.totalorder %s21_s18, 2  ;;  %p40_p1 = scmp.ne.s32.totalorder %s624_s12, %s620_s11 }
   0x7   : > { %p41_p2 = scmp.eq.s32.totalorder %s644_s17, 0  ;;  %p66_p5 = scmp.ne.s32.totalorder %s616_s10, %s612_s9 }
   0x8   : > { %s822_s18 = smov (%p22_p0, %s21_s18), 0  ;;  %s824_s19 = smov (!%p22_p0, %s24_s19), %s640_s16 }
   0x9   : > { %p718_p3 = por %p41_p2, %p40_p1  ;;  %p26_p4 = scmp.ge.s32.totalorder %s824_s19, 2 }
   0xa   : > { %s28_s21 = ssub.s32 %s636_s15, %s822_s18  ;;  %s33_s22 = sadd.s32 1, %s624_s12 }
   0xb   : > { %s826_s19 = smov (%p26_p4, %s824_s19), 0  ;;  %p729_p6 = por %p66_p5, %p41_p2 }
   0xc   : > { %s29_s24 = ssub.s32 %s640_s16, %s826_s19  ;;  %s59_s25 = sadd.s32 1, %s616_s10 }
   0xd   : > { %s30_s26 = sor.u32 %s29_s24, %s28_s21  ;;  %p57_p7 = scmp.eq.s32.totalorder %s29_s24, 0 }
   0xe   : > { %p31_p8 = scmp.eq.s32.totalorder %s30_s26, 0  ;;  %p468_p9 = scmp.ge.s32.totalorder %s644_s17, 4 }
   0xf   : > { %s737_s27 = scalar_select %p57_p7, %s616_s10, %s59_s25  }
  0x10   : > { %s740_s28 = scalar_select %p31_p8, %s624_s12, %s33_s22  }
  0x11   : > { %120 = sbr.rel (%p468_p9) target bundleno = 34 (0x22), region = 16 }
  0x16   : > { %123 = sbr.rel (!%p718_p3) target bundleno = 29 (0x1d), region = 20  ;;  %s125_s29 = sand.u32 (%p718_p3), 1, %s624_s12  }
  0x17   : > { %s470_s30 = sshll.u32 (%p718_p3), %s636_s15, 2  ;;  %s469_s3 = sshll.u32 (%p718_p3), %s125_s29, 4 }
  0x18   : > { %s129_s4 = sadd.s32 (%p718_p3), %s640_s16, %s470_s30  ;;  %s127_s21 = scalar_lea.vmem (%p718_p3), [#allocation2], %s469_s3 }
  0x19   : > { %s471_s5 = sshll.u32 (%p718_p3), %s129_s4, 3 }
  0x1a   : > { %s131_s8 = scalar_lea.vmem (%p718_p3), %s808_s0, %s471_s5 }
  0x1b   : > { %v162_v0 = vld [vmem:[%s131_s8] sm:$0xff]  ;;  %v164_v1 = vld [vmem:[%s131_s8 + $0x10] sm:$0xff] }
  0x1c   : > { %163 = vst [vmem:[%s127_s21] sm:$0xff] %v162_v0  ;;  %165 = vst [vmem:[%s127_s21 + $0x8] sm:$0xff] %v164_v1 }
  0x1d PF: > { %171 = sbr.rel (!%p729_p6) target bundleno = 34 (0x22), region = 58  ;;  %s173_s20 = sand.u32 (%p729_p6), 1, %s616_s10  }
  0x1e   : > { %s473_s22 = sshll.u32 (%p729_p6), %s640_s16, 3  ;;  %s472_s24 = sshll.u32 (%p729_p6), %s173_s20, 4 }
  0x1f   : > { %s177_s29 = scalar_lea.vmem (%p729_p6), %s809_s1, %s473_s22  ;;  %s175_s30 = scalar_lea.vmem (%p729_p6), [#allocation3], %s472_s24 }
  0x20   : > { %v208_v2 = vld [vmem:[%s177_s29] sm:$0xff] (%p729_p6)  ;;  %v210_v3 = vld [vmem:[%s177_s29 + $0x10] sm:$0xff] (%p729_p6) }
  0x21   : > { %209 = vst [vmem:[%s175_s30] sm:$0xff] (%p729_p6), %v208_v2  ;;  %211 = vst [vmem:[%s175_s30 + $0x8] sm:$0xff] (%p729_p6), %v210_v3 }
  0x22 PF: > { %p474_p10 = scmp.ge.s32.totalorder %s644_s17, 1  ;;  %p216_p11 = scmp.lt.s32.totalorder %s644_s17, 5 }
  0x24   : > { %p217_p12 = pnand %p474_p10, %p216_p11 }
  0x25   : > { %s230_s23 = sand.u32 (!%p217_p12), 1, %s612_s9   ;;  %s223_s4 = sand.u32 (!%p217_p12), 1, %s620_s11  }
  0x26   : > { %220 = sbr.rel (%p217_p12) target bundleno = 491 (0x1eb), region = 96  ;;  %s476_s3 = sshll.u32 (!%p217_p12), %s230_s23, 4 }
  0x27   : > { %s475_s5 = sshll.u32 (!%p217_p12), %s223_s4, 4  ;;  %s232_s6 = scalar_lea.vmem (!%p217_p12), [#allocation3], %s476_s3 }
  0x28   : > { %s646_s7 = smov (!%p217_p12), 127   ;;  %s225_s8 = scalar_lea.vmem (!%p217_p12), [#allocation2], %s475_s5 }
  0x29   : > { %s649_s9 = smov (!%p217_p12), 64   ;;  %p258_p13 = scmp.lt.s32.totalorder (!%p217_p12), %s628_s13, 1 }
  0x2a   : > { %p260_p0 = scmp.lt.s32.totalorder (!%p217_p12), %s632_s14, 1 }
  0x2b   : > { %vm270_vm0 = vcmask 523264   ;;  %v269_v4 = vld [vmem:[%s232_s6 + $0x8] sm:$0xff]  ;;  %v762_v6 = vld [vmem:[%s225_s8] sm:$0xff]  ;;  %v647_v12 = vmov 1   ;;  %v648_v13 = vmov 0   ;;  %s828_s13 = smov (!%p258_p13, %s628_s13), 1 }
  0x2c   : > { %307 = vrot.lane.b32.xlu1 %v269_v4, %s646_s7  ;;  %v267_v5 = vld [vmem:[%s225_s8 + $0x8] sm:$0xff]  ;;  %v277_v10 = vmul.f32 %v762_v6, %v762_v6  ;;  %559 = vset.pattern.permute.xlu0 %v648_v13  ;;  %v268_v14 = vld [vmem:[%s232_s6] sm:$0xff]  ;;  %v271_v15 = vsel %vm270_vm0, %v762_v6, 0.0  ;;  %s830_s14 = smov (!%p260_p0, %s632_s14), 1  ;;  %s477_s11 = sshll.u32 %s828_s13, 1 }
  0x2d   : > { %v274_v7 = vsel %vm270_vm0, %v267_v5, 0.0  ;;  %v278_v8 = vmul.f32 %v267_v5, %v267_v5  ;;  %560 = vset.pattern.permute.xlu1 %v647_v12  ;;  %s263_s21 = sadd.s32 %s477_s11, %s830_s14 }
  0x2e   : > { %275 = vadd.xlane.f32.xlu0 %v274_v7  ;;  %v279_v11 = vsel %vm270_vm0, %v277_v10, 0.0  ;;  %s478_s20 = sshll.u32 %s263_s21, 3 }
  0x2f   : > { %v282_v9 = vsel %vm270_vm0, %v278_v8, 0.0  ;;  %s265_s25 = scalar_lea.vmem %s810_s2, %s478_s20 }
  0x32   : > { %283 = vadd.xlane.f32.xlu0 %v282_v9 }
  0x36   : > { %280 = vadd.xlane.f32.xlu0 %v279_v11 }
  0x4c   : > { %305 = vrot.lane.b32.xlu0 %v268_v14, %s646_s7 }
  0x50   : > { %272 = vadd.xlane.f32.xlu1 %v271_v15 }
  0x9e   : > { %v308_v18 = vpop.permute.xlu1 %307 }
  0xb7   : > { %v276_v16 = vpop.xlane.xlu0 %275 }
  0xb8   : > { %v286_v17 = vmul.f32 0.015625, %v276_v16 }
  0xba   : > { %v302_v19 = vmul.f32 %v286_v17, %v269_v4  ;;  %v290_v22 = vmul.f32 %v286_v17, %v286_v17  ;;  %v314_v42 = vsub.f32 %v267_v5, %v286_v17 }
  0xbb   : > { %v284_v20 = vpop.xlane.xlu0 %283 }
  0xbc   : > { %v312_v21 = vadd.f32 %v308_v18, %v302_v19  ;;  %v288_v23 = vmul.f32 0.015625, %v284_v20 }
  0xbe   : > { %v292_v24 = vsub.f32 %v288_v23, %v290_v22  ;;  %334 = vperm.xlu1 %560, %v312_v21  }
  0xbf   : > { %v281_v29 = vpop.xlane.xlu0 %280 }
  0xc0   : > { %v294_v25 = vmax.f32 %v292_v24, 0.0  ;;  %v287_v32 = vmul.f32 0.015625, %v281_v29 }
  0xc2   : > { %v296_v26 = vadd.f32 1e-05, %v294_v25 }
  0xc3   : > { %v306_v40 = vpop.permute.xlu0 %305 }
  0xc4   : > { %562 = vrsqrt.f32 %v296_v26 }
  0xd1   : > { %v563_v27 = vpop.eup %562 }
  0xd2   : > { %v300_v28 = vmul.f32 %v563_v27, %v269_v4 }
  0xd4   : > { %322 = vperm.xlu0 %559, %v300_v28  }
  0xd9   : > { %v273_v30 = vpop.xlane.xlu1 %272 }
  0xda   : > { %v285_v31 = vmul.f32 0.015625, %v273_v30 }
  0xdc   : > { %v289_v33 = vmul.f32 %v285_v31, %v285_v31  ;;  %v301_v38 = vmul.f32 %v285_v31, %v268_v14  ;;  %v313_v53 = vsub.f32 %v762_v6, %v285_v31 }
  0xde   : > { %v291_v34 = vsub.f32 %v287_v32, %v289_v33  ;;  %v311_v41 = vadd.f32 %v306_v40, %v301_v38 }
  0xe0   : > { %v293_v35 = vmax.f32 %v291_v34, 0.0 }
  0xe2   : > { %v295_v36 = vadd.f32 1e-05, %v293_v35 }
  0xe4   : > { %564 = vrsqrt.f32 %v295_v36 }
  0xf1   : > { %v565_v37 = vpop.eup %564 }
  0xf2   : > { %v299_v39 = vmul.f32 %v565_v37, %v268_v14 }
  0xf4   : > { %317 = vperm.xlu0 %559, %v299_v39  }
  0xf8   : > { %561 = vset.pattern.permute.xlu0 %v647_v12 }
  0xf9   : > { %329 = vperm.xlu0 %561, %v311_v41  }
 0x139   : > { %v335_v45 = vpop.permute.xlu1 %334 }
 0x14f   : > { %v323_v43 = vpop.permute.xlu0 %322 }
 0x150   : > { %v326_v44 = vmul.f32 %v323_v43, %v314_v42 }
 0x152   : > { %v338_v46 = vadd.f32 %v335_v45, %v326_v44 }
 0x154   : > { %v480_v47 = vmul.f32 -1.442695, %v338_v46 }
 0x156   : > { %566 = vpow2.f32 %v480_v47 }
 0x163   : > { %v567_v48 = vpop.eup %566 }
 0x164   : > { %v346_v49 = vadd.f32 1.0, %v567_v48 }
 0x166   : > { %568 = vrcp.f32 %v346_v49 }
 0x16f   : > { %v318_v52 = vpop.permute.xlu0 %317 }
 0x170   : > { %v325_v55 = vmul.f32 %v318_v52, %v313_v53 }
 0x173   : > { %v569_v50 = vpop.eup %568 }
 0x174   : > { %v352_v51 = vmul.f32 %v569_v50, %v267_v5  ;;  %v330_v54 = vpop.permute.xlu0 %329 }
 0x175   : > { %v337_v56 = vadd.f32 %v330_v54, %v325_v55 }
 0x176   : > { %354 = vrot.lane.b32.xlu0 %v352_v51, %s649_s9 }
 0x177   : > { %v479_v57 = vmul.f32 -1.442695, %v337_v56 }
 0x179   : > { %570 = vpow2.f32 %v479_v57 }
 0x186   : > { %v571_v58 = vpop.eup %570 }
 0x187   : > { %v345_v59 = vadd.f32 1.0, %v571_v58 }
 0x189   : > { %572 = vrcp.f32 %v345_v59 }
 0x196   : > { %v573_v60 = vpop.eup %572 }
 0x197   : > { %v351_v61 = vmul.f32 %v573_v60, %v762_v6 }
 0x1e8   : > { %v355_v62 = vpop.permute.xlu0 %354 }
 0x1e9   : > { %v357_v63 = vsel %vm270_vm0, %v351_v61, %v355_v62 }
 0x1ea   : > { %358 = vst [vmem:[%s265_s25] sm:$0xff] %v357_v63 }
 0x1eb PF: > { %s12_s17 = sadd.s32 1, %s644_s17   ;;  %s813_s9 = smov %s616_s10 }
 0x1ec   : > { %p9_p1 = scmp.ge.s32.totalorder %s12_s17, 6   ;;  %s814_s10 = smov %s737_s27 }
 0x1ed   : > { %s815_s11 = smov %s624_s12  ;;  %s816_s12 = smov %s740_s28 }
 0x1ee   : > { %s817_s13 = smov %s636_s15  ;;  %s818_s14 = smov %s640_s16 }
 0x1ef   : > { %s819_s15 = smov %s822_s18  ;;  %s820_s16 = smov %s826_s19 }
 0x1f0   :  { %11 = sbr.rel (!%p9_p1) target bundleno = 5 (0x5), region = 147 }

</bundles_post_ra>
